<compile_context>
chip_gen: v7x
topology: tpu7x:2x2x1
jax: 0.10.0
libtpu: 0.0.40
codegen_flags: <defaults>
</compile_context>

<pallas_src>
import functools

import jax
import jax.numpy as jnp
from jax.experimental import pallas as pl
from jax.experimental.pallas import tpu as pltpu

INPUT_SIZE = 561
HIDDEN1 = 100
HIDDEN2 = 50
NUM_CLASSES = 6

# Padded (lane/sublane aligned) sizes used inside the kernel.
K_PAD = 640       # 561 -> 5 * 128 (padded contraction dim for fc1, padding lives only in VMEM)
H1_PAD = 128      # 100 -> 128
H2_PAD = 128      # 50  -> 128
OUT_PAD = 128     # 6   -> 128  (lane-dense output block, unmasked stores)

MAX_TILE_B = 2048  # rows of the batch per grid step
MIN_TILE_B = 16    # bf16 sublane packing (16, 128)


def _cdiv(a, b):
    return (a + b - 1) // b


def _round_up(x, m):
    return _cdiv(x, m) * m


def _choose_tile_b(b):
    """>=2 grid steps when the batch allows it (both v7x TCs), minimal ragged waste."""
    n_steps = max(_cdiv(b, MAX_TILE_B), 2 if b >= 2 * MIN_TILE_B else 1)
    tile_b = _round_up(_cdiv(b, n_steps), MIN_TILE_B)
    return max(MIN_TILE_B, min(tile_b, MAX_TILE_B))


def _mlp_kernel(x_ref, w1_ref, b1_ref, w2_ref, b2_ref, w3_ref, b3_ref, o_ref, xp_ref):
    tb = x_ref.shape[0]

    # In-VMEM cast + zero-pad of the native f32 x tile (no extra HBM passes in the wrapper).
    # Pad columns are rewritten every step, so this is safe under "parallel" core splitting.
    xp_ref[:, INPUT_SIZE:] = jnp.zeros((tb, K_PAD - INPUT_SIZE), dtype=jnp.bfloat16)
    xp_ref[:, :INPUT_SIZE] = x_ref[...].astype(jnp.bfloat16)

    # fc1 + ReLU  (bf16 MXU matmul, f32 accumulate; bias/ReLU stay f32 -- v5e has no bf16 VPU)
    h1 = jnp.dot(xp_ref[...], w1_ref[...], preferred_element_type=jnp.float32)
    h1 = jnp.maximum(h1 + b1_ref[...], 0.0)
    # dropout(p=0.2): eval-mode identity
    # TODO(synk): training-mode dropout (Bernoulli mask + 1/(1-p) scale) not implemented.

    # fc2 + ReLU
    h2 = jnp.dot(h1.astype(jnp.bfloat16), w2_ref[...], preferred_element_type=jnp.float32)
    h2 = jnp.maximum(h2 + b2_ref[...], 0.0)

    # fc3 logits (padded to 128 lanes; padded cols are exactly zero).  bf16 writeback halves
    # the output HBM stream; the wrapper slices the 6 real logits and casts to f32.
    out = jnp.dot(h2.astype(jnp.bfloat16), w3_ref[...], preferred_element_type=jnp.float32)
    o_ref[...] = (out + b3_ref[...]).astype(o_ref.dtype)


def _pad2(a, rows, cols, dtype):
    """Zero-pad a 2-D array to (rows, cols) and cast."""
    r, c = a.shape
    out = jnp.zeros((rows, cols), dtype=dtype)
    return out.at[:r, :c].set(a.astype(dtype))


def _pack_params(params):
    """Pad weights to aligned shapes (bf16) and biases to lane-dense f32 rows (tiny, one-off)."""
    w1, b1, w2, b2, w3, b3 = params
    w1p = _pad2(w1, K_PAD, H1_PAD, jnp.bfloat16)
    w2p = _pad2(w2, H1_PAD, H2_PAD, jnp.bfloat16)
    w3p = _pad2(w3, H2_PAD, OUT_PAD, jnp.bfloat16)
    b1p = _pad2(b1, 1, H1_PAD, jnp.float32)
    b2p = _pad2(b2, 1, H2_PAD, jnp.float32)
    b3p = _pad2(b3, 1, OUT_PAD, jnp.float32)
    return w1p, b1p, w2p, b2p, w3p, b3p


def har_student_forward(x, params):
    """Reproduces HARStudent.forward semantics (eval mode).

    Shape-adaptation glue (unsqueeze / flatten / truncate / pad-to-561) stays in plain JAX and
    is a no-op for the common (b, 561) f32 case, so the kernel streams x straight from its
    native HBM layout.  The MLP hot path runs inside one batch-tiled Pallas kernel.
    """
    w1p, b1p, w2p, b2p, w3p, b3p = _pack_params(params)

    # --- preprocessing glue (matches the PyTorch forward) ---
    if x.ndim == 1:
        x = x[None, :]
    if x.ndim > 2:
        x = x.reshape(x.shape[0], -1)
    if x.dtype != jnp.float32:
        x = x.astype(jnp.float32)
    f = x.shape[1]
    if f > INPUT_SIZE:
        x = x[:, :INPUT_SIZE]
    elif f < INPUT_SIZE:
        x = jnp.pad(x, ((0, 0), (0, INPUT_SIZE - f)))
    b = x.shape[0]

    # --- batch tiling: ragged last block, no batch-pad concatenate ---
    tile_b = _choose_tile_b(b)
    grid = (_cdiv(b, tile_b),)

    flops = 2 * grid[0] * tile_b * (K_PAD * H1_PAD + H1_PAD * H2_PAD + H2_PAD * OUT_PAD)
    bytes_accessed = (
        b * INPUT_SIZE * 4                                              # x (native f32)
        + (K_PAD * H1_PAD + H1_PAD * H2_PAD + H2_PAD * OUT_PAD) * 2    # weights (bf16)
        + (H1_PAD + H2_PAD + OUT_PAD) * 4                              # biases (f32)
        + grid[0] * tile_b * OUT_PAD * 2                               # output (bf16)
    )

    out = pl.pallas_call(
        _mlp_kernel,
        out_shape=jax.ShapeDtypeStruct((b, OUT_PAD), jnp.bfloat16),
        grid_spec=pltpu.PrefetchScalarGridSpec(
            num_scalar_prefetch=0,
            grid=grid,
            in_specs=[
                pl.BlockSpec((tile_b, INPUT_SIZE), lambda i: (i, 0)),   # x, native layout
                pl.BlockSpec((K_PAD, H1_PAD), lambda i: (0, 0)),        # w1 (resident)
                pl.BlockSpec((1, H1_PAD), lambda i: (0, 0)),            # b1
                pl.BlockSpec((H1_PAD, H2_PAD), lambda i: (0, 0)),       # w2
                pl.BlockSpec((1, H2_PAD), lambda i: (0, 0)),            # b2
                pl.BlockSpec((H2_PAD, OUT_PAD), lambda i: (0, 0)),      # w3
                pl.BlockSpec((1, OUT_PAD), lambda i: (0, 0)),           # b3
            ],
            out_specs=pl.BlockSpec((tile_b, OUT_PAD), lambda i: (i, 0)),
            scratch_shapes=[pltpu.VMEM((tile_b, K_PAD), jnp.bfloat16)],  # in-kernel pad buffer
        ),
        compiler_params=pltpu.CompilerParams(
            dimension_semantics=("parallel",)),
        cost_estimate=pl.CostEstimate(
            flops=flops, bytes_accessed=bytes_accessed, transcendentals=0),
    )(x, w1p, b1p, w2p, b2p, w3p, b3p)

    # Slice the 6 real logits out of the lane-dense block; return f32 for callers.
    return out[:, :NUM_CLASSES].astype(jnp.float32)


def init_params(key):
    """Deterministic init mirroring nn.Linear shapes (weights stored as (in, out))."""
    ks = jax.random.split(key, 6)

    def linear(kw, kb, fan_in, fan_out):
        bound = 1.0 / jnp.sqrt(jnp.float32(fan_in))
        w = jax.random.uniform(kw, (fan_in, fan_out), jnp.float32, -bound, bound)
        bias = jax.random.uniform(kb, (1, fan_out), jnp.float32, -bound, bound)
        return w, bias

    w1, b1 = linear(ks[0], ks[1], INPUT_SIZE, HIDDEN1)
    w2, b2 = linear(ks[2], ks[3], HIDDEN1, HIDDEN2)
    w3, b3 = linear(ks[4], ks[5], HIDDEN2, NUM_CLASSES)
    return (w1, b1, w2, b2, w3, b3)


def reference_forward(x, params, *, bf16=True):
    """Plain-JAX reference. bf16=True mirrors the kernel's mixed precision (incl. bf16 logits)."""
    w1, b1, w2, b2, w3, b3 = params
    if x.ndim == 1:
        x = x[None, :]
    if x.ndim > 2:
        x = x.reshape(x.shape[0], -1)
    f = x.shape[1]
    if f > INPUT_SIZE:
        x = x[:, :INPUT_SIZE]
    elif f < INPUT_SIZE:
        x = jnp.pad(x, ((0, 0), (0, INPUT_SIZE - f)))
    cast = (lambda a: a.astype(jnp.bfloat16)) if bf16 else (lambda a: a.astype(jnp.float32))
    dot = functools.partial(jnp.dot, preferred_element_type=jnp.float32)
    h = jnp.maximum(dot(cast(x), cast(w1)) + b1, 0.0)
    h = jnp.maximum(dot(cast(h), cast(w2)) + b2, 0.0)
    out = dot(cast(h), cast(w3)) + b3
    if bf16:
        out = out.astype(jnp.bfloat16).astype(jnp.float32)  # mirror the kernel's bf16 writeback
    return out


if __name__ == "__main__":
    key = jax.random.PRNGKey(0)
    kp, kx1, kx2 = jax.random.split(key, 3)
    params = init_params(kp)

    # small batch of flat HAR feature vectors: (batch=4, features=561)
    x = jax.random.normal(kx1, (4, INPUT_SIZE), dtype=jnp.float32)
    out = jax.block_until_ready(har_student_forward(x, params))
    assert out.shape == (4, NUM_CLASSES)

    ref_bf16 = jax.block_until_ready(reference_forward(x, params, bf16=True))
    assert jnp.allclose(out, ref_bf16, atol=1e-2, rtol=1e-2)
    ref_f32 = jax.block_until_ready(reference_forward(x, params, bf16=False))
    assert jnp.allclose(out, ref_f32, atol=5e-2, rtol=5e-2)

    # multi-step grid with a ragged last block (exercises the 2-TensorCore split + row clipping)
    x2 = jax.random.normal(kx2, (40, INPUT_SIZE), dtype=jnp.float32)
    out2 = jax.block_until_ready(har_student_forward(x2, params))
    ref2 = reference_forward(x2, params, bf16=True)
    assert out2.shape == (40, NUM_CLASSES)
    assert jnp.allclose(out2, ref2, atol=1e-2, rtol=1e-2)

    print("KERNEL_OK")
</pallas_src>

<mosaic_0001>
module attributes {stable_mosaic.version = 11 : i64} {
  func.func @_mlp_kernel(%arg0: i32, %arg1: memref<16x561xf32, #tpu.memory_space<vmem>>, %arg2: memref<640x128xbf16, #tpu.memory_space<vmem>>, %arg3: memref<1x128xf32, #tpu.memory_space<vmem>>, %arg4: memref<128x128xbf16, #tpu.memory_space<vmem>>, %arg5: memref<1x128xf32, #tpu.memory_space<vmem>>, %arg6: memref<128x128xbf16, #tpu.memory_space<vmem>>, %arg7: memref<1x128xf32, #tpu.memory_space<vmem>>, %arg8: memref<16x128xbf16, #tpu.memory_space<vmem>>, %arg9: memref<16x640xbf16, #tpu.memory_space<vmem>>) attributes {dimension_semantics = [#tpu.dimension_semantics<parallel>], iteration_bounds = array<i64: 1>, scalar_prefetch = 0 : i64, scratch_operands = 1 : i64, tpu.core_type = #tpu.core_type<tc>, window_params = [{transform_indices = @transform_0, window_bounds = array<i64: 16, 561>}, {pipeline_mode = #tpu.pipeline_mode<synchronous>, transform_indices = @transform_1, window_bounds = array<i64: 640, 128>}, {pipeline_mode = #tpu.pipeline_mode<synchronous>, transform_indices = @transform_2, window_bounds = array<i64: 1, 128>}, {pipeline_mode = #tpu.pipeline_mode<synchronous>, transform_indices = @transform_3, window_bounds = array<i64: 128, 128>}, {pipeline_mode = #tpu.pipeline_mode<synchronous>, transform_indices = @transform_4, window_bounds = array<i64: 1, 128>}, {pipeline_mode = #tpu.pipeline_mode<synchronous>, transform_indices = @transform_5, window_bounds = array<i64: 128, 128>}, {pipeline_mode = #tpu.pipeline_mode<synchronous>, transform_indices = @transform_6, window_bounds = array<i64: 1, 128>}, {transform_indices = @transform_7, window_bounds = array<i64: 16, 128>}]} {
    %cst = arith.constant 0.000000e+00 : bf16
    %0 = vector.broadcast %cst : bf16 to vector<16x79xbf16>
    %c0 = arith.constant 0 : index
    %c561 = arith.constant 561 : index
    %1 = vector.load %arg9[%c0, %c561] : memref<16x640xbf16, #tpu.memory_space<vmem>>, vector<16x79xbf16>
    tpu.vector_store %arg9[%c0, %c561], %0 {strides = array<i32>} : memref<16x640xbf16, #tpu.memory_space<vmem>>, vector<16x79xbf16>,
    %c0_0 = arith.constant 0 : index
    %c0_1 = arith.constant 0 : index
    %2 = vector.load %arg1[%c0_0, %c0_1] : memref<16x561xf32, #tpu.memory_space<vmem>>, vector<16x561xf32>
    %3 = arith.truncf %2 : vector<16x561xf32> to vector<16x561xbf16>
    %c0_2 = arith.constant 0 : index
    %c0_3 = arith.constant 0 : index
    %4 = vector.load %arg9[%c0_2, %c0_3] : memref<16x640xbf16, #tpu.memory_space<vmem>>, vector<16x561xbf16>
    tpu.vector_store %arg9[%c0_2, %c0_3], %3 {strides = array<i32>} : memref<16x640xbf16, #tpu.memory_space<vmem>>, vector<16x561xbf16>,
    %c0_4 = arith.constant 0 : index
    %c0_5 = arith.constant 0 : index
    %5 = vector.load %arg9[%c0_4, %c0_5] : memref<16x640xbf16, #tpu.memory_space<vmem>>, vector<16x640xbf16>
    %c0_6 = arith.constant 0 : index
    %c0_7 = arith.constant 0 : index
    %6 = vector.load %arg2[%c0_6, %c0_7] : memref<640x128xbf16, #tpu.memory_space<vmem>>, vector<640x128xbf16>
    %cst_8 = arith.constant dense<0.000000e+00> : vector<16x128xf32>
    %7 = tpu.matmul %5, %6, %cst_8 {dimension_numbers = #tpu.dot_dimension_numbers<[1], [0], [0], [1], [0, 0, 1, 1], [], []>} : vector<16x640xbf16>, vector<640x128xbf16>, vector<16x128xf32> -> vector<16x128xf32>
    %c0_9 = arith.constant 0 : index
    %c0_10 = arith.constant 0 : index
    %8 = vector.load %arg3[%c0_9, %c0_10] : memref<1x128xf32, #tpu.memory_space<vmem>>, vector<1x128xf32>
    %9 = vector.broadcast %8 : vector<1x128xf32> to vector<16x128xf32>
    %10 = arith.addf %7, %9 : vector<16x128xf32>
    %cst_11 = arith.constant 0.000000e+00 : f32
    %11 = vector.broadcast %cst_11 : f32 to vector<16x128xf32>
    %12 = arith.maximumf %10, %11 : vector<16x128xf32>
    %13 = arith.truncf %12 : vector<16x128xf32> to vector<16x128xbf16>
    %c0_12 = arith.constant 0 : index
    %c0_13 = arith.constant 0 : index
    %14 = vector.load %arg4[%c0_12, %c0_13] : memref<128x128xbf16, #tpu.memory_space<vmem>>, vector<128x128xbf16>
    %cst_14 = arith.constant dense<0.000000e+00> : vector<16x128xf32>
    %15 = tpu.matmul %13, %14, %cst_14 {dimension_numbers = #tpu.dot_dimension_numbers<[1], [0], [0], [1], [0, 0, 1, 1], [], []>} : vector<16x128xbf16>, vector<128x128xbf16>, vector<16x128xf32> -> vector<16x128xf32>
    %c0_15 = arith.constant 0 : index
    %c0_16 = arith.constant 0 : index
    %16 = vector.load %arg5[%c0_15, %c0_16] : memref<1x128xf32, #tpu.memory_space<vmem>>, vector<1x128xf32>
    %17 = vector.broadcast %16 : vector<1x128xf32> to vector<16x128xf32>
    %18 = arith.addf %15, %17 : vector<16x128xf32>
    %cst_17 = arith.constant 0.000000e+00 : f32
    %19 = vector.broadcast %cst_17 : f32 to vector<16x128xf32>
    %20 = arith.maximumf %18, %19 : vector<16x128xf32>
    %21 = arith.truncf %20 : vector<16x128xf32> to vector<16x128xbf16>
    %c0_18 = arith.constant 0 : index
    %c0_19 = arith.constant 0 : index
    %22 = vector.load %arg6[%c0_18, %c0_19] : memref<128x128xbf16, #tpu.memory_space<vmem>>, vector<128x128xbf16>
    %cst_20 = arith.constant dense<0.000000e+00> : vector<16x128xf32>
    %23 = tpu.matmul %21, %22, %cst_20 {dimension_numbers = #tpu.dot_dimension_numbers<[1], [0], [0], [1], [0, 0, 1, 1], [], []>} : vector<16x128xbf16>, vector<128x128xbf16>, vector<16x128xf32> -> vector<16x128xf32>
    %c0_21 = arith.constant 0 : index
    %c0_22 = arith.constant 0 : index
    %24 = vector.load %arg7[%c0_21, %c0_22] : memref<1x128xf32, #tpu.memory_space<vmem>>, vector<1x128xf32>
    %25 = vector.broadcast %24 : vector<1x128xf32> to vector<16x128xf32>
    %26 = arith.addf %23, %25 : vector<16x128xf32>
    %27 = arith.truncf %26 : vector<16x128xf32> to vector<16x128xbf16>
    %c0_23 = arith.constant 0 : index
    %c0_24 = arith.constant 0 : index
    %28 = vector.load %arg8[%c0_23, %c0_24] : memref<16x128xbf16, #tpu.memory_space<vmem>>, vector<16x128xbf16>
    tpu.vector_store %arg8[%c0_23, %c0_24], %27 {strides = array<i32>} : memref<16x128xbf16, #tpu.memory_space<vmem>>, vector<16x128xbf16>,
    return
  }
  func.func @transform_0(%arg0: i32) -> (i32, i32) {
    %c0_i32 = arith.constant 0 : i32
    %c0_i32_0 = arith.constant 0 : i32
    return %arg0, %c0_i32 : i32, i32
  }
  func.func @transform_1(%arg0: i32) -> (i32, i32) {
    %c0_i32 = arith.constant 0 : i32
    %c0_i32_0 = arith.constant 0 : i32
    %c0_i32_1 = arith.constant 0 : i32
    return %c0_i32, %c0_i32_0 : i32, i32
  }
  func.func @transform_2(%arg0: i32) -> (i32, i32) {
    %c0_i32 = arith.constant 0 : i32
    %c0_i32_0 = arith.constant 0 : i32
    %c0_i32_1 = arith.constant 0 : i32
    return %c0_i32, %c0_i32_0 : i32, i32
  }
  func.func @transform_3(%arg0: i32) -> (i32, i32) {
    %c0_i32 = arith.constant 0 : i32
    %c0_i32_0 = arith.constant 0 : i32
    %c0_i32_1 = arith.constant 0 : i32
    return %c0_i32, %c0_i32_0 : i32, i32
  }
  func.func @transform_4(%arg0: i32) -> (i32, i32) {
    %c0_i32 = arith.constant 0 : i32
    %c0_i32_0 = arith.constant 0 : i32
    %c0_i32_1 = arith.constant 0 : i32
    return %c0_i32, %c0_i32_0 : i32, i32
  }
  func.func @transform_5(%arg0: i32) -> (i32, i32) {
    %c0_i32 = arith.constant 0 : i32
    %c0_i32_0 = arith.constant 0 : i32
    %c0_i32_1 = arith.constant 0 : i32
    return %c0_i32, %c0_i32_0 : i32, i32
  }
  func.func @transform_6(%arg0: i32) -> (i32, i32) {
    %c0_i32 = arith.constant 0 : i32
    %c0_i32_0 = arith.constant 0 : i32
    %c0_i32_1 = arith.constant 0 : i32
    return %c0_i32, %c0_i32_0 : i32, i32
  }
  func.func @transform_7(%arg0: i32) -> (i32, i32) {
    %c0_i32 = arith.constant 0 : i32
    %c0_i32_0 = arith.constant 0 : i32
    return %arg0, %c0_i32 : i32, i32
  }
}

</mosaic_0001>

<bundles_post_ra>
// kernel: tpu_custom_call.1
= control target key start
LH: loop header
LB: loop body
LE: loop exit
PB: predicated region body
PF: predicated region fallthrough
CT: control target
= control target key end

     0   :  { %12 = vsyncpa [#allocation4], 0  ;;  %s1437_s0 = inlined_call_operand.hbm [shape: f32[4,561], index: 0, kind: input, shape index: {}]   ;;  %s1438_s1 = inlined_call_operand.hbm [shape: bf16[640,128], index: 1, kind: input, shape index: {}]   ;;  %s1439_s2 = inlined_call_operand.vmem [shape: f32[1,128], index: 2, kind: input, shape index: {}]   ;;  %s1440_s3 = inlined_call_operand.hbm [shape: bf16[128,128], index: 3, kind: input, shape index: {}]   ;;  %s1441_s4 = inlined_call_operand.vmem [shape: f32[1,128], index: 4, kind: input, shape index: {}]   ;;  %s1442_s5 = inlined_call_operand.hbm [shape: bf16[128,128], index: 5, kind: input, shape index: {}]   ;;  %s1443_s6 = inlined_call_operand.vmem [shape: f32[1,128], index: 6, kind: input, shape index: {}]   ;;  %s1444_s7 = inlined_call_operand.hbm [shape: bf16[4,128], index: 7, kind: output, shape index: {}]  }
   0x1   :  { %13 = vsyncpa [#allocation7], 0 }
   0x2   :  { %14 = vsyncpa [#allocation10], 0 }
   0x3   :  { %15 = vsyncpa [#allocation5], 0 }
   0x4   :  { %20 = vsyncadd [#allocation4], 960  ;;  %s1267_s24 = smov [#allocation6]   ;;  %s1149_s28 = scalar_lea.hbm %s1438_s1, 5120 }
   0x5   :  { %s33_s25 = sshll.u32 %s1267_s24, 4  ;;  %p1150_p0 = scmp.ne.s32.totalorder %s1438_s1, %s1149_s28  ;;  %s34_s25 = int_to_ptr.vmem [resolvable:$true] %s33_s25 }
   0x6   :  { %p1153_p1 = scmp.lt.u32.totalorder %s1149_s28, %s1438_s1 }
   0x8   :  { %p1155_p2 = pnand %p1153_p1, %p1150_p0 }
   0xa   :  { %1158 = shalt.err (!%p1155_p2)
}
   0xb   :  { %s1159_s10 = scalar_lea.vmem %s34_s25, 5120  ;;  %p1164_p4 = scmp.lt.s32.totalorder %s34_s25, %s34_s25 }
   0xc   :  { %p1160_p3 = scmp.ne.s32.totalorder %s34_s25, %s1159_s10  ;;  %p1165_p5 = scmp.lt.s32.totalorder %s1159_s10, %s1159_s10 }
   0xe   :  { %p1166_p6 = por %p1165_p5, %p1164_p4 }
  0x10   :  { %p1167_p7 = pnand %p1166_p6, %p1160_p3 }
  0x12   :  { %1170 = shalt.err (!%p1167_p7)
}
  0x13   :  { %s1268_s11 = smov 64   ;;  %s1269_s12 = smov 4  }
  0x14   :  { %39 = dma.hbm_to_vmem [thread:$0]  %s1438_s1, 5120, %s34_s25, [#allocation7], %s1268_s11, %s1268_s11, %s1269_s12  }
  0x15   :  { %s1270_s15 = smov [#allocation3]   ;;  %s1171_s19 = scalar_lea.hbm %s1437_s0, 320 }
  0x16   :  { %s21_s16 = sshll.u32 %s1270_s15, 4  ;;  %p1172_p8 = scmp.ne.s32.totalorder %s1437_s0, %s1171_s19  ;;  %s22_s16 = int_to_ptr.vmem [resolvable:$true] %s21_s16 }
  0x17   :  { %p1175_p9 = scmp.lt.u32.totalorder %s1171_s19, %s1437_s0 }
  0x19   :  { %p1177_p10 = pnand %p1175_p9, %p1172_p8 }
  0x1b   :  { %1180 = shalt.err (!%p1177_p10)
}
  0x1c   :  { %s1181_s24 = scalar_lea.vmem %s22_s16, 320  ;;  %s1185_s1 = scalar_lea.vmem %s22_s16, 1280 }
  0x1d   :  { %p1182_p11 = scmp.ne.s32.totalorder %s22_s16, %s1181_s24  ;;  %p1186_p12 = scmp.lt.s32.totalorder %s22_s16, %s22_s16 }
  0x1e   :  { %p1187_p13 = scmp.lt.s32.totalorder %s1185_s1, %s1181_s24 }
  0x20   :  { %p1188_p0 = por %p1187_p13, %p1186_p12 }
  0x22   :  { %p1189_p1 = pnand %p1188_p0, %p1182_p11 }
  0x24   :  { %1192 = shalt.err (!%p1189_p1)
}
  0x25   :  { %s1271_s25 = smov 320   ;;  %s1272_s26 = smov 20  }
  0x26   :  { %27 = dma.hbm_to_vmem [thread:$0]  %s1437_s0, 320, %s22_s16, [#allocation4], %s1271_s25, %s1271_s25, %s1272_s26  }
  0x27   :  { %s1273_s29 = smov [#allocation8]   ;;  %s1274_s8 = smov [#allocation9]  }
  0x28   :  { %s47_s30 = sshll.u32 %s1273_s29, 4  ;;  %s61_s9 = sshll.u32 %s1274_s8, 4  ;;  %s48_s30 = int_to_ptr.vmem [resolvable:$true] %s47_s30  ;;  %s1349_s9 = int_to_ptr.vmem [resolvable:$true] %s61_s9 }
  0x29   :  { %s1193_s14 = scalar_lea.hbm %s1440_s3, 1024 }
  0x2a   :  { %p1194_p2 = scmp.ne.s32.totalorder %s1440_s3, %s1193_s14  ;;  %p1197_p3 = scmp.lt.u32.totalorder %s1193_s14, %s1440_s3 }
  0x2c   :  { %p1199_p4 = pnand %p1197_p3, %p1194_p2 }
  0x2e   :  { %1202 = shalt.err (!%p1199_p4)
}
  0x2f   :  { %s1203_s0 = scalar_lea.vmem %s48_s30, 1024  ;;  %p1208_p6 = scmp.lt.s32.totalorder %s48_s30, %s48_s30 }
  0x30   :  { %p1204_p5 = scmp.ne.s32.totalorder %s48_s30, %s1203_s0  ;;  %p1209_p7 = scmp.lt.s32.totalorder %s1203_s0, %s1203_s0 }
  0x32   :  { %p1210_p8 = por %p1209_p7, %p1208_p6 }
  0x34   :  { %p1211_p9 = pnand %p1210_p8, %p1204_p5 }
  0x36   :  { %1214 = shalt.err (!%p1211_p9)
}
  0x37   :  { %53 = dma.hbm_to_vmem [thread:$0]  %s1440_s3, 1024, %s48_s30, [#allocation7], %s1268_s11, %s1268_s11, %s1269_s12  }
  0x38   :  { %s1215_s23 = scalar_lea.hbm %s1442_s5, 1024 }
  0x39   :  { %p1216_p10 = scmp.ne.s32.totalorder %s1442_s5, %s1215_s23  ;;  %p1219_p11 = scmp.lt.u32.totalorder %s1215_s23, %s1442_s5 }
  0x3b   :  { %p1221_p12 = pnand %p1219_p11, %p1216_p10 }
  0x3d   :  { %1224 = shalt.err (!%p1221_p12)
}
  0x3e   :  { %s1225_s27 = scalar_lea.vmem %s1349_s9, 1024  ;;  %p1230_p0 = scmp.lt.s32.totalorder %s1349_s9, %s1349_s9 }
  0x3f   :  { %p1226_p13 = scmp.ne.s32.totalorder %s1349_s9, %s1225_s27  ;;  %p1231_p1 = scmp.lt.s32.totalorder %s1225_s27, %s1225_s27 }
  0x41   :  { %p1232_p2 = por %p1231_p1, %p1230_p0 }
  0x43   :  { %p1233_p3 = pnand %p1232_p2, %p1226_p13 }
  0x45   :  { %1236 = shalt.err (!%p1233_p3)
}
  0x46   :  { %67 = dma.hbm_to_vmem [thread:$0]  %s1442_s5, 1024, %s1349_s9, [#allocation10], %s1268_s11, %s1268_s11, %s1269_s12  }
  0x47   :  { %1259 = dma.done.wait [#allocation4], 1280  }
  0x48   :  { %1260 = vsyncadd [#allocation4], 4294966016 }
  0x49   :  { %1261 = dma.done.wait [#allocation7], 6144  }
  0x4a   :  { %1262 = vsyncadd [#allocation7], 4294961152 }
  0x4b   :  { %1263 = dma.done.wait [#allocation10], 1024  }
  0x4c   :  { %1264 = vsyncadd [#allocation10], 4294966272  ;;  %vm83_vm0 = vcmask 1047944   ;;  %v1275_v0 = vmov 0   ;;  %v1079_v1 = vld [vmem:[#allocation6 + $0x40] sm:$0xff]   ;;  %v1083_v5 = vld [vmem:[#allocation6 + $0x48] sm:$0xff]  }
  0x4d   :  { %84 = vst.msk [vmem:[#allocation2 + $0x20] sm:$0xff] %vm83_vm0, %v1275_v0  ;;  %v1080_v2 = vld [vmem:[#allocation6] sm:$0xff]   ;;  %933 = vmatprep.subr.bf16.mxu0 %v1079_v1  ;;  %v1084_v6 = vld [vmem:[#allocation6 + $0x8] sm:$0xff]   ;;  %v1087_v9 = vld [vmem:[#allocation6 + $0x50] sm:$0xff]   ;;  %v1276_v34 = vmov 0.0   ;;  %vm1277_vm1 = vmmov 0  }
  0x4e   :  { %v1081_v3 = vld [vmem:[#allocation6 + $0xc0] sm:$0xff]   ;;  %934 = vmatpush3.bf16.msra.mxu0 %v1080_v2  ;;  %v1085_v7 = vld [vmem:[#allocation6 + $0xc8] sm:$0xff]   ;;  %v1088_v10 = vld [vmem:[#allocation6 + $0x10] sm:$0xff]   ;;  %vm138_vm2 = vcmask 400384  }
  0x4f   :  { %v1082_v4 = vld [vmem:[#allocation6 + $0x80] sm:$0xff]   ;;  %955 = vmatprep.subr.bf16.mxu1 %v1081_v3  ;;  %935 = vmatprep.subr.bf16.mxu0 %v1083_v5  ;;  %v1086_v8 = vld [vmem:[#allocation6 + $0x88] sm:$0xff]   ;;  %v1089_v11 = vld [vmem:[#allocation6 + $0xd0] sm:$0xff]  }
  0x50   :  { %956 = vmatpush3.bf16.msra.mxu1 %v1082_v4  ;;  %v1090_v12 = vld [vmem:[#allocation6 + $0x90] sm:$0xff]   ;;  %v1091_v13 = vld [vmem:[#allocation6 + $0x58] sm:$0xff]   ;;  %v1095_v17 = vld [vmem:[#allocation6 + $0x60] sm:$0xff]  }
  0x51   :  { %957 = vmatprep.subr.bf16.mxu1 %v1085_v7  ;;  %v1092_v14 = vld [vmem:[#allocation6 + $0x18] sm:$0xff]   ;;  %v1096_v18 = vld [vmem:[#allocation6 + $0x20] sm:$0xff]   ;;  %v1099_v21 = vld [vmem:[#allocation6 + $0x68] sm:$0xff]  }
  0x52   :  { %936 = vmatpush3.bf16.msra.mxu0 %v1084_v6  ;;  %v1093_v15 = vld [vmem:[#allocation6 + $0xd8] sm:$0xff]   ;;  %v1097_v19 = vld [vmem:[#allocation6 + $0xe0] sm:$0xff]   ;;  %v1100_v22 = vld [vmem:[#allocation6 + $0x28] sm:$0xff]  }
  0x53   :  { %937 = vmatprep.subr.bf16.mxu0 %v1087_v9  ;;  %v1094_v16 = vld [vmem:[#allocation6 + $0x98] sm:$0xff]   ;;  %v1098_v20 = vld [vmem:[#allocation6 + $0xa0] sm:$0xff]   ;;  %v1101_v23 = vld [vmem:[#allocation6 + $0xe8] sm:$0xff]  }
  0x54   :  { %958 = vmatpush3.bf16.msra.mxu1 %v1086_v8  ;;  %v1102_v24 = vld [vmem:[#allocation6 + $0xa8] sm:$0xff]   ;;  %v1103_v25 = vld [vmem:[#allocation6 + $0x70] sm:$0xff]   ;;  %v1107_v29 = vld [vmem:[#allocation6 + $0x78] sm:$0xff]  }
  0x55   :  { %959 = vmatprep.subr.bf16.mxu1 %v1089_v11  ;;  %v1104_v26 = vld [vmem:[#allocation6 + $0x30] sm:$0xff]   ;;  %v1108_v30 = vld [vmem:[#allocation6 + $0x38] sm:$0xff]   ;;  %v1121_v42 = vld [vmem:[#allocation6 + $0x100] sm:$0xff]  }
  0x56   :  { %938 = vmatpush3.bf16.msra.mxu0 %v1088_v10  ;;  %v1105_v27 = vld [vmem:[#allocation6 + $0xf0] sm:$0xff]   ;;  %v1109_v31 = vld [vmem:[#allocation6 + $0xf8] sm:$0xff]   ;;  %v1124_v46 = vld [vmem:[#allocation6 + $0x108] sm:$0xff]  }
  0x57   :  { %939 = vmatprep.subr.bf16.mxu0 %v1091_v13  ;;  %v1106_v28 = vld [vmem:[#allocation6 + $0xb0] sm:$0xff]   ;;  %v1114_v35 = vld [vmem:[#allocation6 + $0xb8] sm:$0xff]   ;;  %v1127_v52 = vld [vmem:[#allocation6 + $0x120] sm:$0xff]  }
  0x58   :  { %960 = vmatpush3.bf16.msra.mxu1 %v1090_v12  ;;  %v1110_v32 = vld [vmem:[#allocation3 + $0x4] ss:$20 sps:$4 sm:$0xff]   ;;  %v1112_v33 = vld [vmem:[#allocation3 + $0x2c] ss:$20 sps:$4 sm:$0xff]   ;;  %v1116_v38 = vld [vmem:[#allocation3 + $0x28] ss:$20 sps:$4 sm:$0xff]  }
  0x59   :  { %961 = vmatprep.subr.bf16.mxu1 %v1093_v15  ;;  %v130_v36 = vpack.c.bf16 %v1112_v33, %v1110_v32  ;;  %v1115_v37 = vld [vmem:[#allocation3] ss:$20 sps:$4 sm:$0xff]   ;;  %v1122_v43 = vld [vmem:[#allocation3 + $0x8] ss:$20 sps:$4 sm:$0xff]   ;;  %v1123_v45 = vld [vmem:[#allocation3 + $0x30] ss:$20 sps:$4 sm:$0xff]  }
  0x5a   :  { %940 = vmatpush3.bf16.msra.mxu0 %v1092_v14  ;;  %v129_v39 = vpack.c.bf16 %v1116_v38, %v1115_v37  ;;  %v1117_v40 = vld [vmem:[#allocation3 + $0xc] ss:$20 sps:$4 sm:$0xff]   ;;  %v1119_v41 = vld [vmem:[#allocation3 + $0x34] ss:$20 sps:$4 sm:$0xff]   ;;  %v131_v47 = vpack.c.bf16 %v1123_v45, %v1122_v43  ;;  %v1131_v50 = vld [vmem:[#allocation3 + $0x10] ss:$20 sps:$4 sm:$0xff]  }
  0x5b   :  { %941 = vmatprep.subr.bf16.mxu0 %v1095_v17  ;;  %504 = vmatprep.mubr.bf16.mxu0 %v130_v36  ;;  %v132_v44 = vpack.c.bf16 %v1119_v41, %v1117_v40  ;;  %v1125_v48 = vld [vmem:[#allocation6 + $0x110] sm:$0xff]   ;;  %v1126_v49 = vld [vmem:[#allocation6 + $0x118] sm:$0xff]   ;;  %v1128_v54 = vld [vmem:[#allocation6 + $0x128] sm:$0xff]  }
  0x5c   :  { %962 = vmatpush3.bf16.msra.mxu1 %v1094_v16  ;;  %v1132_v51 = vld [vmem:[#allocation3 + $0x38] ss:$20 sps:$4 sm:$0xff]   ;;  %v1129_v55 = vld [vmem:[#allocation6 + $0x130] sm:$0xff]   ;;  %v1133_v58 = vld [vmem:[#allocation8] sm:$0xff]  }
  0x5d   :  { %963 = vmatprep.subr.bf16.mxu1 %v1097_v19  ;;  %545 = vmatprep.mubr.bf16.mxu1 %v132_v44  ;;  %v133_v53 = vpack.c.bf16 %v1132_v51, %v1131_v50  ;;  %v1130_v56 = vld [vmem:[#allocation6 + $0x138] sm:$0xff]   ;;  %v1134_v59 = vld [vmem:[#allocation8 + $0x8] sm:$0xff]   ;;  %v1135_v60 = vld [vmem:[#allocation8 + $0x10] sm:$0xff]  }
  0x5e   :  { %942 = vmatpush3.bf16.msra.mxu0 %v1096_v18  ;;  %v1136_v61 = vld [vmem:[#allocation8 + $0x18] sm:$0xff]   ;;  %v1137_v62 = vld [vmem:[#allocation8 + $0x20] sm:$0xff]   ;;  %v1138_v63 = vld [vmem:[#allocation8 + $0x28] sm:$0xff]  }
  0x5f   :  { %943 = vmatprep.subr.bf16.mxu0 %v1099_v21  ;;  %139 = vst.msk [vmem:[#allocation2 + $0x20] sm:$0xff] %vm138_vm2, %v133_v53  ;;  %v1139_v0 = vld [vmem:[#allocation8 + $0x30] sm:$0xff]   ;;  %v1140_v1 = vld [vmem:[#allocation8 + $0x38] sm:$0xff]   ;;  %v1141_v2 = vld [vmem:[#allocation9] sm:$0xff]  }
  0x60   :  { %964 = vmatpush3.bf16.msra.mxu1 %v1098_v20  ;;  %v1142_v3 = vld [vmem:[#allocation9 + $0x8] sm:$0xff]   ;;  %v1143_v4 = vld [vmem:[#allocation9 + $0x10] sm:$0xff]   ;;  %v1144_v5 = vld [vmem:[#allocation9 + $0x18] sm:$0xff]  }
  0x61   :  { %965 = vmatprep.subr.bf16.mxu1 %v1101_v23  ;;  %v1145_v6 = vld [vmem:[#allocation9 + $0x20] sm:$0xff]   ;;  %v1146_v7 = vld [vmem:[#allocation9 + $0x28] sm:$0xff]   ;;  %v1148_v36 = vld [vmem:[#allocation9 + $0x38] sm:$0xff]  }
  0x62   :  { %944 = vmatpush3.bf16.msra.mxu0 %v1100_v22  ;;  %v871_v9 = vld [vmem:[%s1439_s2] ss:$0 sm:$0xff] }
  0x63   :  { %945 = vmatprep.subr.bf16.mxu0 %v1103_v25  ;;  %v912_v37 = vld [vmem:[%s1441_s4] ss:$0 sm:$0xff] }
  0x64   :  { %966 = vmatpush3.bf16.msra.mxu1 %v1102_v24  ;;  %v921_v51 = vld [vmem:[%s1443_s6] ss:$0 sm:$0xff] }
  0x65   :  { %967 = vmatprep.subr.bf16.mxu1 %v1105_v27 }
  0x66   :  { %946 = vmatpush3.bf16.msra.mxu0 %v1104_v26  ;;  %v144_v57 = vld [vmem:[#allocation2 + $0x20] sm:$0xff] }
  0x67   :  { %947 = vmatprep.subr.bf16.mxu0 %v1107_v29 }
  0x68   :  { %968 = vmatpush3.bf16.msra.mxu1 %v1106_v28 }
  0x69   :  { %969 = vmatprep.subr.bf16.mxu1 %v1109_v31 }
  0x6a   :  { %948 = vmatpush3.bf16.msra.mxu0 %v1108_v30 }
  0x6b   :  { %1004 = vmatprep.subr.bf16.mxu0 %v1276_v34 }
  0x6c   :  { %970 = vmatpush3.bf16.msra.mxu1 %v1114_v35  ;;  %v1147_v35 = vld [vmem:[#allocation9 + $0x30] sm:$0xff]  }
  0x6d   :  { %1024 = vmatprep.subr.bf16.mxu1 %v1276_v34  ;;  %505 = vmatmul.mubr.bf16.vlgmr.msra.gmra.mrb[0].mxu0 %v129_v39 }
  0x6e   :  { %1005 = vmatpush3.bf16.msra.mxu0 %v1121_v42  ;;  %1020 = vmatprep.mubr.msk.bf16.mxu0 %vm1277_vm1, %v1276_v34 }
  0x6f   :  { %1006 = vmatprep.subr.bf16.mxu0 %v1276_v34  ;;  %546 = vmatmul.mubr.bf16.vlgmr.msra.gmra.mrb[0].mxu1 %v131_v47  ;;  %v1278_v47 = vmov 1983009808  }
  0x70   :  { %1040 = vmatprep.mubr.msk.bf16.mxu1 %vm1277_vm1, %v1276_v34  ;;  %1025 = vmatpush3.bf16.msra.mxu1 %v1133_v58 }
  0x71   :  { %1026 = vmatprep.subr.bf16.mxu1 %v1276_v34 }
  0x72   :  { %1007 = vmatpush3.bf16.msra.mxu0 %v1124_v46 }
  0x73   :  { %1008 = vmatprep.subr.bf16.mxu0 %v1276_v34 }
  0x74   :  { %1027 = vmatpush3.bf16.msra.mxu1 %v1134_v59 }
  0x75   :  { %1028 = vmatprep.subr.bf16.mxu1 %v1276_v34 }
  0x76   :  { %1009 = vmatpush3.bf16.msra.mxu0 %v1125_v48  ;;  %v829_v48 = vunpack.c.l.s4 %v1278_v47 }
  0x77   :  { %1010 = vmatprep.subr.bf16.mxu0 %v1276_v34 }
  0x78   :  { %1029 = vmatpush3.bf16.msra.mxu1 %v1135_v60 }
  0x79   :  { %1030 = vmatprep.subr.bf16.mxu1 %v1276_v34 }
  0x7a   :  { %1011 = vmatpush3.bf16.msra.mxu0 %v1126_v49  ;;  %v831_v49 = vlaneseq }
  0x7b   :  { %1012 = vmatprep.subr.bf16.mxu0 %v1276_v34 }
  0x7c   :  { %1031 = vmatpush3.bf16.msra.mxu1 %v1136_v61  ;;  %v832_v50 = vshrl.u32 %v831_v49, 7 }
  0x7d   :  { %1032 = vmatprep.subr.bf16.mxu1 %v1276_v34 }
  0x7e   :  { %1013 = vmatpush3.bf16.msra.mxu0 %v1127_v52 }
  0x7f   :  { %1014 = vmatprep.subr.bf16.mxu0 %v1276_v34 }
  0x80   :  { %1033 = vmatpush3.bf16.msra.mxu1 %v1137_v62 }
  0x81   :  { %1034 = vmatprep.subr.bf16.mxu1 %v1276_v34 }
  0x82   :  { %1015 = vmatpush3.bf16.msra.mxu0 %v1128_v54 }
  0x83   :  { %1016 = vmatprep.subr.bf16.mxu0 %v1276_v34 }
  0x84   :  { %1035 = vmatpush3.bf16.msra.mxu1 %v1138_v63 }
  0x85   :  { %1036 = vmatprep.subr.bf16.mxu1 %v1276_v34 }
  0x86   :  { %1017 = vmatpush3.bf16.msra.mxu0 %v1129_v55 }
  0x87   :  { %1018 = vmatprep.subr.bf16.mxu0 %v1276_v34 }
  0x88   :  { %1037 = vmatpush3.bf16.msra.mxu1 %v1139_v0 }
  0x89   :  { %1038 = vmatprep.subr.bf16.mxu1 %v1276_v34 }
  0x8a   :  { %1019 = vmatpush3.bf16.msra.mxu0 %v1130_v56 }
  0x8b   :  { %1044 = vmatprep.subr.bf16.mxu0 %v1276_v34 }
  0x8c   :  { %1039 = vmatpush3.bf16.msra.mxu1 %v1140_v1 }
  0x8d   :  { %1021 = vmatmul.mubr.bf16.vlgmr.msra.gmra.mrb[4].mxu0 %v144_v57 }
  0x8e   :  { %1060 = vmatprep.mubr.msk.bf16.mxu0 %vm1277_vm1, %v1276_v34  ;;  %1045 = vmatpush3.bf16.msra.mxu0 %v1141_v2 }
  0x8f   :  { %1046 = vmatprep.subr.bf16.mxu0 %v1276_v34 }
  0x92   :  { %1047 = vmatpush3.bf16.msra.mxu0 %v1142_v3 }
  0x93   :  { %1048 = vmatprep.subr.bf16.mxu0 %v1276_v34 }
  0x96   :  { %1049 = vmatpush3.bf16.msra.mxu0 %v1143_v4 }
  0x97   :  { %1050 = vmatprep.subr.bf16.mxu0 %v1276_v34 }
  0x9a   :  { %1051 = vmatpush3.bf16.msra.mxu0 %v1144_v5 }
  0x9b   :  { %1052 = vmatprep.subr.bf16.mxu0 %v1276_v34 }
  0x9e   :  { %1053 = vmatpush3.bf16.msra.mxu0 %v1145_v6 }
  0x9f   :  { %1054 = vmatprep.subr.bf16.mxu0 %v1276_v34 }
  0xa2   :  { %1055 = vmatpush3.bf16.msra.mxu0 %v1146_v7 }
  0xa3   :  { %1056 = vmatprep.subr.bf16.mxu0 %v1276_v34 }
  0xa6   :  { %1057 = vmatpush3.bf16.msra.mxu0 %v1147_v35 }
  0xa7   :  { %1058 = vmatprep.subr.bf16.mxu0 %v1276_v34  ;;  %v830_v34 = vunpack.c.0.s8 %v829_v48 }
  0xa9   :  { %v833_v57 = vsub.s32 %v830_v34, %v832_v50 }
  0xaa   :  { %1059 = vmatpush3.bf16.msra.mxu0 %v1148_v36 }
 0x140   :  { %v949_v8 = vpop.f32.mrb[0].mxu0 }
 0x141   :  { %v950_v10 = vpop.f32.mrb[1].mxu0 }
 0x142   :  { %v951_v11 = vadd.f32 %v950_v10, %v949_v8  ;;  %v952_v12 = vpop.f32.mrb[2].mxu0  ;;  %v971_v15 = vpop.f32.mrb[0].mxu1 }
 0x143   :  { %v953_v13 = vpop.f32.mrb[3].mxu0  ;;  %v972_v17 = vpop.f32.mrb[1].mxu1 }
 0x144   :  { %v507_v14 = vadd.f32 %v951_v11, %v871_v9  ;;  %v954_v16 = vadd.f32 %v953_v13, %v952_v12  ;;  %v973_v19 = vadd.f32 %v972_v17, %v971_v15  ;;  %v974_v20 = vpop.f32.mrb[2].mxu1 }
 0x145   :  { %v975_v21 = vpop.f32.mrb[3].mxu1 }
 0x146   :  { %v510_v18 = vadd.f32 %v954_v16, %v871_v9  ;;  %v976_v22 = vadd.f32 %v975_v21, %v974_v20  ;;  %v548_v23 = vadd.f32 %v973_v19, %v507_v14 }
 0x148   :  { %v551_v24 = vadd.f32 %v976_v22, %v510_v18 }
 0x160   :  { %v588_v25 = vpop.f32.mrb[4].mxu0 }
 0x161   :  { %v589_v26 = vadd.f32 %v588_v25, %v548_v23  ;;  %v1022_v27 = vpop.f32.mrb[5].mxu0 }
 0x162   :  { %v591_v28 = vpop.f32.mrb[6].mxu0 }
 0x163   :  { %v592_v29 = vadd.f32 %v591_v28, %v551_v24  ;;  %v1023_v30 = vpop.f32.mrb[7].mxu0  ;;  %v595_v31 = vmax.f32 %v589_v26, 0.0 }
 0x165   :  { %v596_v32 = vmax.f32 %v592_v29, 0.0 }
 0x167   :  { %v597_v33 = vpack.c.bf16 %v596_v32, %v595_v31 }
 0x169   :  { %1041 = vmatmul.mubr.bf16.vlgmr.msra.gmra.mrb[4].mxu1 %v597_v33 }
 0x23c   :  { %v703_v38 = vpop.f32.mrb[4].mxu1 }
 0x23d   :  { %v704_v39 = vadd.f32 %v912_v37, %v703_v38  ;;  %v1042_v40 = vpop.f32.mrb[5].mxu1 }
 0x23e   :  { %v706_v41 = vpop.f32.mrb[6].mxu1 }
 0x23f   :  { %v707_v42 = vadd.f32 %v912_v37, %v706_v41  ;;  %v1043_v43 = vpop.f32.mrb[7].mxu1  ;;  %v710_v44 = vmax.f32 %v704_v39, 0.0 }
 0x241   :  { %v711_v45 = vmax.f32 %v707_v42, 0.0 }
 0x243   :  { %v712_v46 = vpack.c.bf16 %v711_v45, %v710_v44 }
 0x245   :  { %1061 = vmatmul.mubr.bf16.vlgmr.msra.gmra.mrb[8].mxu0 %v712_v46 }
 0x318   :  { %v818_v52 = vpop.f32.mrb[8].mxu0 }
 0x319   :  { %v1062_v53 = vpop.f32.mrb[9].mxu0  ;;  %v819_v55 = vadd.f32 %v921_v51, %v818_v52 }
 0x31a   :  { %v821_v54 = vpop.f32.mrb[10].mxu0 }
 0x31b   :  { %v822_v56 = vadd.f32 %v921_v51, %v821_v54  ;;  %v1063_v58 = vpop.f32.mrb[11].mxu0 }
 0x31d   :  { %v825_v59 = vpack.c.bf16 %v822_v56, %v819_v55  ;;  %v930_v60 = vpack.c.bf16 %v822_v56, %v822_v56 }
 0x31f   :  { %v834_v61 = vrot.slane %v825_v59, %v833_v57  ;;  %v841_v62 = vrot.slane %v930_v60, %v833_v57  ;;  %931 = vst.sshfl [vmem:[#allocation11] sm:$0x3 pattern:$0x76325410] %v825_v59 }
 0x320   :  { %932 = vst.sshfl [vmem:[#allocation11 + $0x4] sm:$0x3 pattern:$0x76325410] %v930_v60 }
 0x321   :  { %v842_v63 = vcombine.high %v834_v61, %v834_v61  ;;  %v843_v0 = vcombine.high %v841_v62, %v841_v62 }
 0x323   :  { %849 = vst [vmem:[#allocation11 + $0x2] sm:$0x3] %v842_v63  ;;  %851 = vst [vmem:[#allocation11 + $0x6] sm:$0x3] %v843_v0 }
 0x324   :  { %856 = vsyncadd [#allocation5], 96  ;;  %s1279_s4 = smov [#allocation11]  }
 0x325   :  { %s857_s6 = sshll.u32 %s1279_s4, 4  ;;  %s858_s6 = int_to_ptr.vmem [resolvable:$true] %s857_s6 }
 0x326   :  { %s1237_s8 = scalar_lea.vmem %s858_s6, 32  ;;  %s1241_s9 = scalar_lea.vmem %s858_s6, 128 }
 0x327   :  { %p1238_p4 = scmp.ne.s32.totalorder %s858_s6, %s1237_s8  ;;  %p1242_p5 = scmp.lt.s32.totalorder %s858_s6, %s858_s6 }
 0x328   :  { %p1243_p6 = scmp.lt.s32.totalorder %s1241_s9, %s1237_s8 }
 0x32a   :  { %p1244_p7 = por %p1243_p6, %p1242_p5 }
 0x32c   :  { %p1245_p8 = pnand %p1244_p7, %p1238_p4 }
 0x32e   :  { %1248 = shalt.err (!%p1245_p8)
}
 0x32f   :  { %s1249_s14 = scalar_lea.hbm %s1444_s7, 32 }
 0x330   :  { %p1250_p9 = scmp.ne.s32.totalorder %s1444_s7, %s1249_s14  ;;  %p1253_p10 = scmp.lt.u32.totalorder %s1249_s14, %s1444_s7 }
 0x332   :  { %p1255_p11 = pnand %p1253_p10, %p1250_p9 }
 0x334   :  { %1258 = shalt.err (!%p1255_p11)
}
 0x335   :  { %s1280_s0 = smov 32   ;;  %s1281_s16 = smov 2  }
 0x336   :  { %863 = dma.vmem_to_hbm [thread:$0]  %s858_s6, 32, %s1444_s7, [#allocation5], %s1280_s0, %s1280_s0, %s1281_s16  }
 0x337   :  { %1265 = dma.done.wait [#allocation5], 128  }
 0x338   :  { %1266 = vsyncadd [#allocation5], 4294967168 }
 0x339   :  { %867 = vsyncpa [#allocation4], 1 }
 0x33a   :  { %868 = vsyncpa [#allocation7], 1 }
 0x33b   :  { %869 = vsyncpa [#allocation10], 1 }
 0x33c   :  { %870 = vsyncpa [#allocation5], 1 }

</bundles_post_ra>
